<compile_context>
chip_gen: v6e
topology: v6e:2x2x1
jax: 0.10.0
libtpu: 0.0.40
codegen_flags: <defaults>
</compile_context>

<pallas_src>
import math
import functools

import numpy as np
import jax
import jax.numpy as jnp
from jax.experimental import pallas as pl
from jax.experimental.pallas import tpu as pltpu


# ----------------------------- glue: parameters -----------------------------

def make_params(key, *, emb_size, n_fft, n_channels, encoder_var=1.0):
    n_freq = n_fft // 2 + 1
    k_w, k_tok = jax.random.split(key, 2)

    # PatchFrequencyEmbedding: Linear(n_freq, emb), weight ~ N(0, sqrt(var/n_freq)), bias = 0
    sigma = (encoder_var / n_freq) ** 0.5
    w_proj = jax.random.normal(k_w, (n_freq, emb_size), jnp.float32) * sigma
    b_proj = jnp.zeros((1, emb_size), jnp.float32)

    # nn.Embedding(n_channels, emb) default init: N(0, 1)
    ch_tokens = jax.random.normal(k_tok, (n_channels, 1, emb_size), jnp.float32)

    return dict(w_proj=w_proj, b_proj=b_proj, ch_tokens=ch_tokens)


def positional_encoding(T, d_model):
    position = np.arange(T, dtype=np.float32)[:, None]
    div_term = np.exp(np.arange(0, d_model, 2, dtype=np.float32)
                      * -(math.log(10000.0) / d_model))
    pe = np.zeros((T, d_model), dtype=np.float32)
    pe[:, 0::2] = np.sin(position * div_term)
    pe[:, 1::2] = np.cos(position * div_term)
    return jnp.asarray(pe)


def _round_up(x, m):
    return ((x + m - 1) // m) * m


def dft_cs_padded(n_fft):
    """Fused [cos | -sin] DFT matrix, zero-padded to a lane-dense width.

    Returns (cs_bf16 of shape (n_fft, 2*half), half, n_freq) where columns
    [0:n_freq] hold cos and [half:half+n_freq] hold -sin; padded columns are
    zero, so their magnitudes come out exactly 0 downstream.
    """
    n_freq = n_fft // 2 + 1
    half = max(64, _round_up(n_freq, 64))            # lane-aligned half width
    n = np.arange(n_fft, dtype=np.float64)[:, None]
    k = np.arange(n_freq, dtype=np.float64)[None, :]
    ang = 2.0 * np.pi * n * k / n_fft
    cs = np.zeros((n_fft, 2 * half), dtype=np.float32)
    cs[:, :n_freq] = np.cos(ang)
    cs[:, half:half + n_freq] = -np.sin(ang)
    return jnp.asarray(cs, dtype=jnp.bfloat16), half, n_freq


# ----------------------------- Pallas kernel --------------------------------

def _biot_kernel(x_ref, cs_ref, wt_ref, out_ref, *, n_fft, hop, T, half, inv_ct):
    # One grid step == one batch element, all channels fused.
    xb = x_ref[0]                                              # (C, L) f32

    # Build STFT frames in VMEM with static strided slices (hop is static).
    # Row order is (t-major, c-minor); irrelevant because everything downstream
    # reduces over all (c, t) rows.
    rows = jnp.concatenate(
        [xb[:, t * hop: t * hop + n_fft] for t in range(T)], axis=0)   # (C*T, n_fft)
    rows = rows.astype(jnp.bfloat16)

    # Fused cos|sin DFT: single bf16 MXU matmul, f32 accumulation.
    res = jnp.dot(rows, cs_ref[...], preferred_element_type=jnp.float32)  # (C*T, 2*half)
    sq = res * res
    mag = jnp.sqrt(sq[:, :half] + sq[:, half:])                # |STFT| (C*T, half); pad cols = 0

    # Linearity (transformer == identity): reduce over (c, t) rows first.
    s_mean = jnp.sum(mag, axis=0, keepdims=True) * inv_ct      # (1, half) f32, mean magnitude

    # Exact-f32 projection on VPU/XLU: broadcast the mean-magnitude row over the
    # transposed weight (emb, half) and reduce over the lane (freq) axis.
    prod = s_mean * wt_ref[...]                                # (emb, half) f32
    out_ref[0] = jnp.sum(prod, axis=1, keepdims=True)          # (emb, 1) f32


def biot_encoder_forward(x, params, *, n_fft, hop_length, emb_size):
    """x: (B, C, L) float32 -> (B, emb_size) float32 (eval mode, perturb=False)."""
    B, C, L = x.shape
    T = 1 + (L - n_fft) // hop_length
    cs, half, n_freq = dft_cs_padded(n_fft)

    # Transposed projection weight, lane-padded to the aligned frequency width.
    w_t = jnp.zeros((emb_size, half), jnp.float32).at[:, :n_freq].set(params["w_proj"].T)

    # Additive constants commute with the (c, t) mean -> add once in the wrapper.
    # (Only valid while the transformer block is identity; see TODO above.)
    pe = positional_encoding(T, emb_size)
    const = (params["b_proj"][0]
             + params["ch_tokens"][:C, 0, :].mean(axis=0)
             + pe.mean(axis=0))                                # (emb,)

    kernel = functools.partial(_biot_kernel, n_fft=n_fft, hop=hop_length,
                               T=T, half=half, inv_ct=1.0 / float(C * T))

    out = pl.pallas_call(
        kernel,
        out_shape=jax.ShapeDtypeStruct((B, emb_size, 1), jnp.float32),
        grid_spec=pltpu.PrefetchScalarGridSpec(
            num_scalar_prefetch=0,
            grid=(B,),
            in_specs=[
                pl.BlockSpec((1, C, L), lambda b: (b, 0, 0)),        # raw signal row
                pl.BlockSpec((n_fft, 2 * half), lambda b: (0, 0)),   # fused [cos|-sin] (bf16)
                pl.BlockSpec((emb_size, half), lambda b: (0, 0)),    # padded W^T (f32)
            ],
            out_specs=pl.BlockSpec((1, emb_size, 1), lambda b: (b, 0, 0)),
        ),
        compiler_params=pltpu.CompilerParams(
            dimension_semantics=("parallel",)),                 # B>=2 -> both v7x TCs
    )(x, cs, w_t)

    return out[:, :, 0] + const[None, :]


# ----------------------------- pure-JAX reference ----------------------------

def frame_signal(x, n_fft, hop):
    """x: (B, C, L) -> frames (B, C, T, n_fft), torch.stft(center=False) framing."""
    B, C, L = x.shape
    T = 1 + (L - n_fft) // hop
    idx = jnp.arange(T)[:, None] * hop + jnp.arange(n_fft)[None, :]
    return x[:, :, idx], T


def biot_encoder_reference(x, params, *, n_fft, hop_length, emb_size):
    B, C, L = x.shape
    frames, T = frame_signal(x, n_fft, hop_length)
    n_freq = n_fft // 2 + 1
    n = np.arange(n_fft, dtype=np.float64)[:, None]
    k = np.arange(n_freq, dtype=np.float64)[None, :]
    ang = 2.0 * np.pi * n * k / n_fft
    cos_m = jnp.asarray(np.cos(ang), jnp.float32)
    sin_m = jnp.asarray(-np.sin(ang), jnp.float32)
    pe = positional_encoding(T, emb_size)

    re = jnp.einsum("bctn,nf->bctf", frames, cos_m)
    im = jnp.einsum("bctn,nf->bctf", frames, sin_m)
    mag = jnp.sqrt(re * re + im * im)                              # (B,C,T,n_freq)
    e = jnp.einsum("bctf,fe->bcte", mag, params["w_proj"]) + params["b_proj"][0]
    e = e + params["ch_tokens"][None, :C, 0, None, :] + pe[None, None, :, :]
    return e.mean(axis=(1, 2))                                     # (B, emb)


# ----------------------------------- main ------------------------------------

if __name__ == "__main__":
    # Small shapes consistent with the module (scaled-down defaults).
    B, C, L = 2, 4, 256
    n_fft, hop_length = 64, 32
    emb_size = 64

    key = jax.random.PRNGKey(0)
    k_params, k_x = jax.random.split(key)
    params = make_params(k_params, emb_size=emb_size, n_fft=n_fft,
                         n_channels=C, encoder_var=1.0)
    x = jax.random.normal(k_x, (B, C, L), jnp.float32)

    out = biot_encoder_forward(x, params, n_fft=n_fft,
                               hop_length=hop_length, emb_size=emb_size)
    out = jax.block_until_ready(out)

    ref = biot_encoder_reference(x, params, n_fft=n_fft,
                                 hop_length=hop_length, emb_size=emb_size)
    np.testing.assert_allclose(np.asarray(out), np.asarray(ref),
                               rtol=2e-2, atol=2e-2)

    print("KERNEL_OK")
</pallas_src>

<mosaic_0001>
module attributes {stable_mosaic.version = 11 : i64} {
  func.func @_biot_kernel(%arg0: i32, %arg1: memref<1x4x256xf32, #tpu.memory_space<vmem>>, %arg2: memref<64x128xbf16, #tpu.memory_space<vmem>>, %arg3: memref<64x64xf32, #tpu.memory_space<vmem>>, %arg4: memref<1x64x1xf32, #tpu.memory_space<vmem>>) attributes {dimension_semantics = [#tpu.dimension_semantics<parallel>], iteration_bounds = array<i64: 2>, scalar_prefetch = 0 : i64, scratch_operands = 0 : i64, tpu.core_type = #tpu.core_type<tc>, window_params = [{transform_indices = @transform_0, window_bounds = array<i64: 1, 4, 256>}, {pipeline_mode = #tpu.pipeline_mode<synchronous>, transform_indices = @transform_1, window_bounds = array<i64: 64, 128>}, {pipeline_mode = #tpu.pipeline_mode<synchronous>, transform_indices = @transform_2, window_bounds = array<i64: 64, 64>}, {transform_indices = @transform_3, window_bounds = array<i64: 1, 64, 1>}]} {
    %c0 = arith.constant 0 : index
    %c0_0 = arith.constant 0 : index
    %c0_1 = arith.constant 0 : index
    %0 = vector.load %arg1[%c0, %c0_0, %c0_1] : memref<1x4x256xf32, #tpu.memory_space<vmem>>, vector<1x4x256xf32>
    %1 = vector.shape_cast %0 : vector<1x4x256xf32> to vector<4x256xf32>
    %2 = vector.extract_strided_slice %1 {offsets = [0, 0], sizes = [4, 64], strides = [1, 1]} : vector<4x256xf32> to vector<4x64xf32>
    %3 = vector.extract_strided_slice %1 {offsets = [0, 32], sizes = [4, 64], strides = [1, 1]} : vector<4x256xf32> to vector<4x64xf32>
    %4 = vector.extract_strided_slice %1 {offsets = [0, 64], sizes = [4, 64], strides = [1, 1]} : vector<4x256xf32> to vector<4x64xf32>
    %5 = vector.extract_strided_slice %1 {offsets = [0, 96], sizes = [4, 64], strides = [1, 1]} : vector<4x256xf32> to vector<4x64xf32>
    %6 = vector.extract_strided_slice %1 {offsets = [0, 128], sizes = [4, 64], strides = [1, 1]} : vector<4x256xf32> to vector<4x64xf32>
    %7 = vector.extract_strided_slice %1 {offsets = [0, 160], sizes = [4, 64], strides = [1, 1]} : vector<4x256xf32> to vector<4x64xf32>
    %8 = vector.extract_strided_slice %1 {offsets = [0, 192], sizes = [4, 64], strides = [1, 1]} : vector<4x256xf32> to vector<4x64xf32>
    %9 = tpu.concatenate %2, %3, %4, %5, %6, %7, %8 in 0 : vector<4x64xf32>, vector<4x64xf32>, vector<4x64xf32>, vector<4x64xf32>, vector<4x64xf32>, vector<4x64xf32>, vector<4x64xf32> -> vector<28x64xf32>
    %10 = arith.truncf %9 : vector<28x64xf32> to vector<28x64xbf16>
    %c0_2 = arith.constant 0 : index
    %c0_3 = arith.constant 0 : index
    %11 = vector.load %arg2[%c0_2, %c0_3] : memref<64x128xbf16, #tpu.memory_space<vmem>>, vector<64x128xbf16>
    %cst = arith.constant dense<0.000000e+00> : vector<28x128xf32>
    %12 = tpu.matmul %10, %11, %cst {dimension_numbers = #tpu.dot_dimension_numbers<[1], [0], [0], [1], [0, 0, 1, 1], [], []>} : vector<28x64xbf16>, vector<64x128xbf16>, vector<28x128xf32> -> vector<28x128xf32>
    %13 = arith.mulf %12, %12 : vector<28x128xf32>
    %14 = vector.extract_strided_slice %13 {offsets = [0, 0], sizes = [28, 64], strides = [1, 1]} : vector<28x128xf32> to vector<28x64xf32>
    %15 = vector.extract_strided_slice %13 {offsets = [0, 64], sizes = [28, 64], strides = [1, 1]} : vector<28x128xf32> to vector<28x64xf32>
    %16 = arith.addf %14, %15 : vector<28x64xf32>
    %17 = math.sqrt %16 : vector<28x64xf32>
    %cst_4 = arith.constant dense<0.000000e+00> : vector<64xf32>
    %18 = vector.multi_reduction <add>, %17, %cst_4 [0] : vector<28x64xf32> to vector<64xf32>
    %19 = vector.shape_cast %18 : vector<64xf32> to vector<1x64xf32>
    %cst_5 = arith.constant 0.0357142873 : f32
    %20 = vector.broadcast %cst_5 : f32 to vector<1x64xf32>
    %21 = arith.mulf %19, %20 : vector<1x64xf32>
    %c0_6 = arith.constant 0 : index
    %c0_7 = arith.constant 0 : index
    %22 = vector.load %arg3[%c0_6, %c0_7] : memref<64x64xf32, #tpu.memory_space<vmem>>, vector<64x64xf32>
    %23 = vector.broadcast %21 : vector<1x64xf32> to vector<64x64xf32>
    %24 = arith.mulf %23, %22 : vector<64x64xf32>
    %cst_8 = arith.constant dense<0.000000e+00> : vector<64xf32>
    %25 = vector.multi_reduction <add>, %24, %cst_8 [1] : vector<64x64xf32> to vector<64xf32>
    %26 = vector.shape_cast %25 : vector<64xf32> to vector<64x1xf32>
    %c0_9 = arith.constant 0 : index
    %c0_10 = arith.constant 0 : index
    %c0_11 = arith.constant 0 : index
    %27 = vector.load %arg4[%c0_9, %c0_10, %c0_11] : memref<1x64x1xf32, #tpu.memory_space<vmem>>, vector<1x64x1xf32>
    %28 = vector.shape_cast %27 : vector<1x64x1xf32> to vector<64x1xf32>
    %29 = vector.shape_cast %26 : vector<64x1xf32> to vector<1x64x1xf32>
    tpu.vector_store %arg4[%c0_9, %c0_10, %c0_11], %29 {strides = array<i32>} : memref<1x64x1xf32, #tpu.memory_space<vmem>>, vector<1x64x1xf32>,
    return
  }
  func.func @transform_0(%arg0: i32) -> (i32, i32, i32) {
    %c0_i32 = arith.constant 0 : i32
    %c0_i32_0 = arith.constant 0 : i32
    %c0_i32_1 = arith.constant 0 : i32
    return %arg0, %c0_i32, %c0_i32_0 : i32, i32, i32
  }
  func.func @transform_1(%arg0: i32) -> (i32, i32) {
    %c0_i32 = arith.constant 0 : i32
    %c0_i32_0 = arith.constant 0 : i32
    %c0_i32_1 = arith.constant 0 : i32
    return %c0_i32, %c0_i32_0 : i32, i32
  }
  func.func @transform_2(%arg0: i32) -> (i32, i32) {
    %c0_i32 = arith.constant 0 : i32
    %c0_i32_0 = arith.constant 0 : i32
    %c0_i32_1 = arith.constant 0 : i32
    return %c0_i32, %c0_i32_0 : i32, i32
  }
  func.func @transform_3(%arg0: i32) -> (i32, i32, i32) {
    %c0_i32 = arith.constant 0 : i32
    %c0_i32_0 = arith.constant 0 : i32
    %c0_i32_1 = arith.constant 0 : i32
    return %arg0, %c0_i32, %c0_i32_0 : i32, i32, i32
  }
}

</mosaic_0001>

<bundles_post_ra>
// kernel: tpu_custom_call.1
= control target key start
LH: loop header
LB: loop body
LE: loop exit
PB: predicated region body
PF: predicated region fallthrough
CT: control target
= control target key end

     0   :  { %8 = vsyncpa [#allocation3], 0  ;;  %s977_s0 = inlined_call_operand.hbm [shape: f32[2,4,256], index: 0, kind: input, shape index: {}]   ;;  %s978_s1 = inlined_call_operand.hbm [shape: bf16[64,128], index: 1, kind: input, shape index: {}]   ;;  %s979_s2 = inlined_call_operand.hbm [shape: f32[64,64], index: 2, kind: input, shape index: {}]   ;;  %s980_s3 = inlined_call_operand.vmem [shape: f32[2,64,1], index: 3, kind: output, shape index: {}]  }
   0x1   :  { %10 = vsyncpa [#allocation3 + $0x1], 0 }
   0x2   :  { %11 = vsyncpa [#allocation5], 0  ;;  %s822_s12 = smov 0   ;;  %s824_s13 = smov 0  }
   0x3   :  { %s826_s14 = smov 0   ;;  %s828_s15 = smov 0  }
   0x4 LB: > { %s841_s16 = sadd.s32 4294967295, %s790_s15   ;;  %p37_p0 = scmp.ne.s32.totalorder %s782_s13, %s778_s12  ;;  %s790_s15 = sphi %s828_s15, %s995_s15   ;;  %s786_s14 = sphi %s826_s14, %s994_s14   ;;  %s782_s13 = sphi %s824_s13, %s993_s13   ;;  %s778_s12 = sphi %s822_s12, %s992_s12  }
   0x5   : > { %p981_p1 = scmp.eq.s32.totalorder %s841_s16, 0  ;;  %p540_p2 = scmp.ge.s32.totalorder %s790_s15, 1 }
   0x6   : > { %p116_p3 = scmp.lt.s32.totalorder %s790_s15, 3  ;;  %s792_s19 = smov [#allocation4]  }
   0x7   : > { %p849_p4 = por %p981_p1, %p37_p0  ;;  %s128_s20 = sshll.u32 %s792_s19, 4  ;;  %s129_s20 = int_to_ptr.vmem [resolvable:$true] %s128_s20 }
   0x8   : > { %p853_p5 = pnand %p540_p2, %p116_p3  ;;  %s793_s22 = smov [#allocation6]  }
   0x9   : > { %s984_s17 = scalar_select %p849_p4, 1, 0 }
   0xa   : > { %s985_s18 = scalar_select %p853_p5, 1, 0 }
   0xb   : > { %p591_p6 = pneg %p853_p5  ;;  %s141_s23 = sshll.u32 %s793_s22, 4  ;;  %s142_s23 = int_to_ptr.vmem [resolvable:$true] %s141_s23 }
   0xc   : > { %s683_s24 = scalar_lea.vmem %s129_s20, 512  ;;  %p691_p12 = scmp.lt.s32.totalorder %s129_s20, %s129_s20 }
   0xd   : > { %p861_p7 = pnand %p591_p6, %p981_p1  ;;  %p684_p9 = scmp.ne.s32.totalorder %s129_s20, %s683_s24 }
   0xe   : > { %p692_p13 = scmp.lt.s32.totalorder %s683_s24, %s683_s24 }
   0xf   : > { %p674_p8 = pneg %p861_p7 }
  0x10   : > { %p693_p0 = por %p692_p13, %p691_p12 }
  0x11   : > { %p686_p10 = pnand %p684_p9, %p674_p8 }
  0x13   : > { %p687_p11 = pneg %p686_p10 }
  0x15   : > { %p694_p2 = pnand %p693_p0, %p687_p11 }
  0x17   : > { %697 = shalt.err (!%p694_p2)
}
  0x18   : > { %s794_s25 = smov 64   ;;  %s795_s26 = smov 4  }
  0x19   : > { %594 = dma.hbm_to_vmem [thread:$0]  (!%p861_p7), %s978_s1, 512, %s129_s20, [#allocation5], %s794_s25, %s794_s25, %s795_s26  }
  0x1a   : > { %s709_s29 = scalar_lea.vmem %s142_s23, 1024  ;;  %p717_p10 = scmp.lt.s32.totalorder %s142_s23, %s142_s23 }
  0x1b   : > { %p710_p3 = scmp.ne.s32.totalorder %s142_s23, %s709_s29  ;;  %p718_p1 = scmp.lt.s32.totalorder %s709_s29, %s709_s29 }
  0x1d   : > { %p712_p6 = pnand %p710_p3, %p674_p8  ;;  %p719_p12 = por %p718_p1, %p717_p10 }
  0x1f   : > { %p713_p9 = pneg %p712_p6 }
  0x21   : > { %p720_p11 = pnand %p719_p12, %p713_p9 }
  0x23   : > { %723 = shalt.err (!%p720_p11)
}
  0x24   : > { %s796_s30 = smov 128   ;;  %s797_s4 = smov 8  }
  0x25   : > { %597 = dma.hbm_to_vmem [thread:$0]  (!%p861_p7), %s979_s2, 1024, %s142_s23, [#allocation5], %s796_s30, %s796_s30, %s797_s4  }
  0x26   : > { %s884_s7 = sadd.s32 1, %s790_s15   ;;  %s24_s9 = sadd.s32 1, %s786_s14 }
  0x27   : > { %s21_s8 = ssub.s32 %s790_s15, %s884_s7  ;;  %p31_p8 = scmp.ne.s32.totalorder %s786_s14, %s782_s13 }
  0x28   : > { %p22_p1 = scmp.eq.s32.totalorder %s21_s8, 0  ;;  %p32_p13 = scmp.eq.s32.totalorder %s790_s15, 0 }
  0x29   : > { %p604_p2 = scmp.lt.s32.totalorder %s790_s15, 2  ;;  %s155_s11 = sand.u32 1, %s786_s14  }
  0x2a   : > { %s893_s10 = scalar_select %p22_p1, %s786_s14, %s24_s9  }
  0x2b   : > { %p33_p0 = por %p32_p13, %p31_p8  ;;  %s561_s12 = sshll.u32 %s790_s15, 7 }
  0x2c   : > { %s544_s19 = sshll.u32 %s155_s11, 3  ;;  %s901_s22 = scalar_lea.hbm %s977_s0, %s561_s12 }
  0x2d   : > { %s159_s23 = scalar_lea.vmem [#allocation2], %s544_s19  ;;  %p903_p7 = pnand %p604_p2, %p33_p0 }
  0x2e   : > { %s167_s24 = sshll.u32 %s159_s23, 4  ;;  %s156_s26 = scalar_lea.sflag [#allocation3], %s155_s11  ;;  %s168_s24 = int_to_ptr.vmem [resolvable:$true] %s167_s24 }
  0x2f   : > { %s724_s27 = scalar_lea.hbm %s901_s22, 128  ;;  %p726_p6 = pneg %p903_p7 }
  0x30   : > { %p725_p3 = scmp.ne.s32.totalorder %s901_s22, %s724_s27  ;;  %s729_s29 = scalar_lea.hbm %s977_s0, 256 }
  0x31   : > { %p730_p12 = scmp.lt.s32.totalorder %s901_s22, %s977_s0  ;;  %p731_p11 = scmp.lt.s32.totalorder %s729_s29, %s724_s27 }
  0x32   : > { %p727_p9 = pnand %p726_p6, %p725_p3 }
  0x33   : > { %p732_p1 = por %p731_p11, %p730_p12 }
  0x34   : > { %p728_p10 = pneg %p727_p9 }
  0x36   : > { %p733_p8 = pnand %p732_p1, %p728_p10 }
  0x38   : > { %736 = shalt.err (!%p733_p8)
}
  0x39   : > { %s737_s5 = scalar_lea.vmem %s168_s24, 128  ;;  %s798_s6 = smov [#allocation2]  }
  0x3a   : > { %p738_p13 = scmp.ne.s32.totalorder %s168_s24, %s737_s5  ;;  %s742_s8 = sshll.u32 %s798_s6, 4  ;;  %s743_s8 = int_to_ptr.vmem [resolvable:$false] %s742_s8 }
  0x3b   : > { %s744_s9 = scalar_lea.vmem %s743_s8, 256  ;;  %p745_p3 = scmp.lt.s32.totalorder %s168_s24, %s743_s8 }
  0x3c   : > { %p740_p0 = pnand %p738_p13, %p726_p6  ;;  %p746_p9 = scmp.lt.s32.totalorder %s744_s9, %s737_s5 }
  0x3e   : > { %p741_p2 = pneg %p740_p0  ;;  %p747_p4 = por %p746_p9, %p745_p3 }
  0x40   : > { %p748_p5 = pnand %p747_p4, %p741_p2 }
  0x42   : > { %751 = shalt.err (!%p748_p5)
}
  0x43   : > { %601 = dma.hbm_to_vmem [thread:$0]  (!%p903_p7), %s901_s22, 128, %s168_s24, %s156_s26  }
  0x44   : > { %p988_p10 = scmp.ne.s32.totalorder %s985_s18, 0 }
  0x45   : > { %s178_s11 = sand.u32 (!%p988_p10), 1, %s782_s13   ;;  %p989_p6 = scmp.ne.s32.totalorder (!%p988_p10), %s984_s17, 0 }
  0x46   : > { %176 = sbr.rel (%p988_p10) target bundleno = 725 (0x2d5), region = 32  ;;  %s548_s12 = sshll.u32 (!%p988_p10), %s178_s11, 3 }
  0x47   : > { %s179_s19 = scalar_lea.sflag (!%p988_p10), [#allocation3], %s178_s11  ;;  %s182_s20 = scalar_lea.vmem (!%p988_p10), [#allocation2], %s548_s12 }
  0x4b   : > { %769 = dma.done.wait (%p989_p6), %s179_s19, 128  }
  0x4c   : > { %771 = vsyncadd (%p989_p6), %s179_s19, 4294967168  ;;  %p990_p4 = scmp.eq.s32.totalorder %s841_s16, 0 }
  0x4e   : > { %773 = dma.done.wait (%p990_p4), [#allocation5], 1536   ;;  %p991_p5 = pmov %p990_p4 }
  0x4f   : > { %v219_v0 = vld [vmem:[%s182_s20] sm:$0xff]  ;;  %s799_s18 = smov 64   ;;  %s800_s21 = smov 32   ;;  %v662_v6 = vld [vmem:[#allocation4 + $0x8] sm:$0xff]   ;;  %v663_v7 = vld [vmem:[#allocation4] sm:$0xff]   ;;  %vm232_vm0 = vcmask 261120  }
  0x50   : > { %775 = vsyncadd (%p991_p5), [#allocation5], 4294965760  ;;  %v221_v1 = vcombine.low %v219_v0, %v219_v0  ;;  %225 = vrot.lane.b32.xlu1 %v219_v0, %s799_s18  ;;  %v235_v2 = vcombine.high %v219_v0, %v219_v0  ;;  %v660_v3 = vld [vmem:[#allocation4 + $0x18] sm:$0xff]   ;;  %v661_v4 = vld [vmem:[#allocation4 + $0x10] sm:$0xff]   ;;  %s801_s17 = smov 96   ;;  %vm243_vm1 = vcmask 1043456  }
  0x51   : > { %569 = vmatprep.subr.bf16.mxu0 %v660_v3  ;;  %vm281_vm2 = vcmask 523264   ;;  %vm394_vm9 = vcmask 519168   ;;  %p213_p7 = scmp.lt.s32.totalorder %s841_s16, 1  ;;  %vm444_vm12 = vcmask 7168  }
  0x52   : > { %v648_v5 = vpack.i.bf16 %v219_v0, %v221_v1  ;;  %570 = vmatpush3.bf16.msra.mxu0 %v660_v3 }
  0x53   : > { %571 = vmatprep.subr.bf16.mxu0 %v661_v4  ;;  %s997_s16 = smov (!%p213_p7, %s841_s16), 1 }
  0x54   : > { %649 = vrot.lane.b32.xlu0 %v648_v5, %s800_s21  ;;  %240 = vrot.lane.b32.xlu1 %v235_v2, %s799_s18  ;;  %s562_s22 = sshll.u32 %s997_s16, 6 }
  0x55   : > { %s217_s25 = scalar_lea.vmem %s980_s3, %s562_s22 }
  0x56   : > { %572 = vmatpush3.bf16.msra.mxu0 %v661_v4 }
  0x57   : > { %573 = vmatprep.subr.bf16.mxu0 %v662_v6 }
  0x58   : > { %654 = vrot.lane.b32.xlu0 %v648_v5, %s801_s17 }
  0x5a   : > { %574 = vmatpush3.bf16.msra.mxu0 %v662_v6 }
  0x5b   : > { %575 = vmatprep.subr.bf16.mxu0 %v663_v7 }
  0x5e   : > { %576 = vmatpush3.bf16.msra.mxu0 %v663_v7  ;;  %v405_v7 = vld [vmem:[#allocation6 + $0x8] sm:$0xff] }
  0xc2   : > { %v226_v8 = vpop.permute.xlu1 %225 }
  0xc6   : > { %v650_v9 = vpop.permute.xlu0 %649  ;;  %v241_v16 = vpop.permute.xlu1 %240 }
  0xc7   : > { %v652_v10 = vunpack.i.h.bf16 %v650_v9  ;;  %v651_v11 = vunpack.i.l.bf16 %v650_v9 }
  0xc9   : > { %v233_v12 = vsel %vm232_vm0, %v651_v11, %v652_v10  ;;  %v408_v10 = vld [vmem:[#allocation6 + $0x20] sm:$0xff]  ;;  %v406_v11 = vld [vmem:[#allocation6 + $0x10] sm:$0xff] }
  0xca   : > { %v655_v13 = vpop.permute.xlu0 %654  ;;  %v245_v17 = vsel %vm243_vm1, %v226_v8, %v233_v12  ;;  %v404_v8 = vld [vmem:[#allocation6] sm:$0xff] }
  0xcb   : > { %v657_v14 = vunpack.i.h.bf16 %v655_v13  ;;  %v656_v15 = vunpack.i.l.bf16 %v655_v13 }
  0xcd   : > { %v246_v18 = vsel %vm243_vm1, %v235_v2, %v657_v14  ;;  %v244_v19 = vsel %vm243_vm1, %v219_v0, %v656_v15 }
  0xce   : > { %v248_v20 = vpack.c.bf16 %v241_v16, %v246_v18  ;;  %v247_v21 = vpack.c.bf16 %v245_v17, %v244_v19  ;;  %v410_v18 = vld [vmem:[#allocation6 + $0x30] sm:$0xff]  ;;  %v407_v19 = vld [vmem:[#allocation6 + $0x18] sm:$0xff] }
  0xd0   : > { %577 = vmatprep.mubr.msk.bf16.mxu0 %vm281_vm2, %v247_v21 }
  0xd1   : > { %578 = vmatmul.mubr.msk.bf16.vlgmr.msra.gmra.mxu0 %vm281_vm2, %v248_v20 }
 0x191   : > { %v579_v22 = vpop.f32.mrf.mxu0 }
 0x192   : > { %v339_v27 = vmul.f32 %v579_v22, %v579_v22 }
 0x193   : > { %v322_v23 = vpop.f32.mrf.mxu0 }
 0x194   : > { %v337_v24 = vmul.f32 %v322_v23, %v322_v23 }
 0x195   : > { %v580_v25 = vpop.f32.mrf.mxu0 }
 0x196   : > { %345 = vrot.lane.b32.xlu0 %v337_v24, %s799_s18  ;;  %v340_v29 = vmul.f32 %v580_v25, %v580_v25 }
 0x197   : > { %v325_v26 = vpop.f32.mrf.mxu0 }
 0x198   : > { %v338_v28 = vmul.f32 %v325_v26, %v325_v26 }
 0x19a   : > { %349 = vrot.lane.b32.xlu0 %v339_v27, %s799_s18  ;;  %347 = vrot.lane.b32.xlu1 %v338_v28, %s799_s18 }
 0x19e   : > { %351 = vrot.lane.b32.xlu1 %v340_v29, %s799_s18 }
 0x208   : > { %v346_v30 = vpop.permute.xlu0 %345 }
 0x209   : > { %v357_v31 = vadd.f32 %v346_v30, %v337_v24  ;;  %v409_v24 = vld [vmem:[#allocation6 + $0x28] sm:$0xff] }
 0x20b   : > { %664 = vrsqrt.f32 %v357_v31  ;;  %vm363_vm3 = vcmp.eq.f32.partialorder %v357_v31, inf  ;;  %v366_v43 = vand.u32 2147483648, %v357_v31  ;;  %vm365_vm4 = vcmp.eq.f32.partialorder %v357_v31, 0.0 }
 0x20c   : > { %v350_v32 = vpop.permute.xlu0 %349  ;;  %v348_v33 = vpop.permute.xlu1 %347 }
 0x20d   : > { %v359_v34 = vadd.f32 %v350_v32, %v339_v27  ;;  %v358_v35 = vadd.f32 %v348_v33, %v338_v28  ;;  %v411_v28 = vld [vmem:[#allocation6 + $0x38] sm:$0xff] }
 0x20f   : > { %666 = vrsqrt.f32 %v359_v34  ;;  %vm377_vm5 = vcmp.eq.f32.partialorder %v359_v34, inf  ;;  %v380_v45 = vand.u32 2147483648, %v359_v34  ;;  %vm370_vm6 = vcmp.eq.f32.partialorder %v358_v35, inf }
 0x210   : > { %668 = vrsqrt.f32 %v358_v35  ;;  %v352_v36 = vpop.permute.xlu1 %351  ;;  %v373_v49 = vand.u32 2147483648, %v358_v35  ;;  %vm379_vm7 = vcmp.eq.f32.partialorder %v359_v34, 0.0  ;;  %vm372_vm8 = vcmp.eq.f32.partialorder %v358_v35, 0.0 }
 0x211   : > { %v360_v37 = vadd.f32 %v352_v36, %v340_v29 }
 0x213   : > { %670 = vrsqrt.f32 %v360_v37  ;;  %vm384_vm10 = vcmp.eq.f32.partialorder %v360_v37, inf  ;;  %v387_v57 = vand.u32 2147483648, %v360_v37  ;;  %vm386_vm11 = vcmp.eq.f32.partialorder %v360_v37, 0.0 }
 0x218   : > { %v665_v38 = vpop.eup %664 }
 0x219   : > { %v362_v39 = vmul.f32 %v665_v38, %v357_v31 }
 0x21b   : > { %v364_v41 = vsel %vm363_vm3, %v357_v31, %v362_v39 }
 0x21c   : > { %v667_v40 = vpop.eup %666  ;;  %v367_v47 = vsel %vm365_vm4, %v366_v43, %v364_v41 }
 0x21d   : > { %v669_v42 = vpop.eup %668  ;;  %v376_v44 = vmul.f32 %v667_v40, %v359_v34  ;;  %v389_v55 = vsel %vm281_vm2, %v367_v47, 0.0 }
 0x21e   : > { %v369_v46 = vmul.f32 %v669_v42, %v358_v35 }
 0x21f   : > { %v378_v48 = vsel %vm377_vm5, %v359_v34, %v376_v44 }
 0x220   : > { %v671_v50 = vpop.eup %670  ;;  %v371_v51 = vsel %vm370_vm6, %v358_v35, %v369_v46  ;;  %v381_v52 = vsel %vm379_vm7, %v380_v45, %v378_v48 }
 0x221   : > { %v374_v53 = vsel %vm372_vm8, %v373_v49, %v371_v51  ;;  %v383_v54 = vmul.f32 %v671_v50, %v360_v37  ;;  %v392_v60 = vsel %vm281_vm2, %v381_v52, 0.0 }
 0x222   : > { %v390_v56 = vsel %vm281_vm2, %v374_v53, 0.0 }
 0x223   : > { %v391_v58 = vadd.f32 %v390_v56, %v389_v55  ;;  %v385_v59 = vsel %vm384_vm10, %v360_v37, %v383_v54 }
 0x224   : > { %v388_v61 = vsel %vm386_vm11, %v387_v57, %v385_v59 }
 0x225   : > { %v393_v62 = vadd.f32 %v392_v60, %v391_v58  ;;  %v395_v63 = vsel %vm394_vm9, %v388_v61, 0.0 }
 0x227   : > { %v396_v0 = vadd.f32 %v395_v63, %v393_v62 }
 0x229   : > { %v397_v1 = vrot.slane %v396_v0, 4 }
 0x22b   : > { %v398_v2 = vadd.f32 %v397_v1, %v396_v0 }
 0x22d   : > { %v399_v3 = vrot.slane %v398_v2, 2 }
 0x22f   : > { %v400_v4 = vadd.f32 %v399_v3, %v398_v2 }
 0x231   : > { %v401_v5 = vrot.slane %v400_v4, 1 }
 0x233   : > { %v402_v6 = vadd.f32 %v401_v5, %v400_v4 }
 0x235   : > { %v403_v9 = vmul.f32 0.035714287, %v402_v6 }
 0x237   : > { %v413_v12 = vmul.f32 %v405_v7, %v403_v9  ;;  %v412_v13 = vmul.f32 %v404_v8, %v403_v9  ;;  %v416_v16 = vmul.f32 %v408_v10, %v403_v9  ;;  %v414_v17 = vmul.f32 %v406_v11, %v403_v9 }
 0x238   : > { %v418_v22 = vmul.f32 %v410_v18, %v403_v9  ;;  %v415_v23 = vmul.f32 %v407_v19, %v403_v9  ;;  %v417_v27 = vmul.f32 %v409_v24, %v403_v9  ;;  %v419_v30 = vmul.f32 %v411_v28, %v403_v9 }
 0x239   : > { %v423_v14 = vsel %vm281_vm2, %v413_v12, 0.0  ;;  %v420_v15 = vsel %vm281_vm2, %v412_v13, 0.0  ;;  %v432_v20 = vsel %vm281_vm2, %v416_v16, 0.0  ;;  %v426_v21 = vsel %vm281_vm2, %v414_v17, 0.0 }
 0x23a   : > { %424 = vadd.xlane.f32.xlu1 %v423_v14  ;;  %421 = vadd.xlane.f32.xlu0 %v420_v15  ;;  %v438_v25 = vsel %vm281_vm2, %v418_v22, 0.0  ;;  %v429_v26 = vsel %vm281_vm2, %v415_v23, 0.0  ;;  %v435_v29 = vsel %vm281_vm2, %v417_v27, 0.0  ;;  %v441_v31 = vsel %vm281_vm2, %v419_v30, 0.0 }
 0x23e   : > { %433 = vadd.xlane.f32.xlu1 %v432_v20  ;;  %427 = vadd.xlane.f32.xlu0 %v426_v21 }
 0x242   : > { %439 = vadd.xlane.f32.xlu1 %v438_v25  ;;  %430 = vadd.xlane.f32.xlu0 %v429_v26 }
 0x246   : > { %436 = vadd.xlane.f32.xlu0 %v435_v29 }
 0x24a   : > { %442 = vadd.xlane.f32.xlu0 %v441_v31 }
 0x2c3   : > { %v425_v32 = vpop.xlane.xlu1 %424  ;;  %v422_v33 = vpop.xlane.xlu0 %421 }
 0x2c4   : > { %446 = vst.msk [vmem:[%s217_s25 + $0x8] sm:$0xff] %vm444_vm12, %v425_v32  ;;  %445 = vst.msk [vmem:[%s217_s25] sm:$0xff] %vm444_vm12, %v422_v33 }
 0x2c7   : > { %v434_v34 = vpop.xlane.xlu1 %433  ;;  %v428_v35 = vpop.xlane.xlu0 %427 }
 0x2c8   : > { %449 = vst.msk [vmem:[%s217_s25 + $0x20] sm:$0xff] %vm444_vm12, %v434_v34  ;;  %447 = vst.msk [vmem:[%s217_s25 + $0x10] sm:$0xff] %vm444_vm12, %v428_v35 }
 0x2cb   : > { %v440_v36 = vpop.xlane.xlu1 %439  ;;  %v431_v37 = vpop.xlane.xlu0 %430 }
 0x2cc   : > { %451 = vst.msk [vmem:[%s217_s25 + $0x30] sm:$0xff] %vm444_vm12, %v440_v36  ;;  %448 = vst.msk [vmem:[%s217_s25 + $0x18] sm:$0xff] %vm444_vm12, %v431_v37 }
 0x2cf   : > { %v437_v38 = vpop.xlane.xlu0 %436 }
 0x2d0   : > { %450 = vst.msk [vmem:[%s217_s25 + $0x28] sm:$0xff] %vm444_vm12, %v437_v38 }
 0x2d3   : > { %v443_v39 = vpop.xlane.xlu0 %442 }
 0x2d4   : > { %452 = vst.msk [vmem:[%s217_s25 + $0x38] sm:$0xff] %vm444_vm12, %v443_v39 }
 0x2d5 PF: > { %p14_p12 = scmp.ge.s32.totalorder %s884_s7, 4   ;;  %s992_s12 = smov %s782_s13 }
 0x2d6   : > { %s993_s13 = smov %s786_s14  ;;  %s994_s14 = smov %s893_s10 }
 0x2d7   : > { %s995_s15 = smov %s884_s7  ;;  %16 = sbr.rel (!%p14_p12) target bundleno = 4 (0x4), region = 80 }
 0x2dc   :  { %474 = vsyncpa [#allocation3], 1 }
 0x2dd   :  { %476 = vsyncpa [#allocation3 + $0x1], 1 }
 0x2de   :  { %477 = vsyncpa [#allocation5], 1 }

</bundles_post_ra>
